<compile_context>
chip_gen: v6e
topology: v6e:2x2x1
jax: 0.10.0
libtpu: 0.0.40
codegen_flags: <defaults>
</compile_context>

<pallas_src>
import jax
import jax.numpy as jnp
from jax.experimental import pallas as pl
from jax.experimental.pallas import tpu as pltpu

EMB_SIZE = 64
VAR_NFEATS = 19
LN_EPS = 1e-5


def mlp2_policy_kernel(x_ref, w1_ref, b1_ref, w2_ref, o_ref):
    # x_ref: (19, tile_n) feature-major block of variable_features.
    x = x_ref[...].astype(jnp.float32)

    # ---- LayerNorm(19) over the feature (sublane) axis; affine folded into W1'/b1'.
    # Biased variance, matching torch.nn.LayerNorm.
    mean = jnp.mean(x, axis=0, keepdims=True)              # (1, tile_n)
    centered = x - mean
    var = jnp.mean(centered * centered, axis=0, keepdims=True)
    xn = centered * jax.lax.rsqrt(var + LN_EPS)             # (19, tile_n)

    # ---- Linear(19 -> 64) (LN affine already folded in) + ReLU, on the MXU.
    h = jnp.dot(w1_ref[...], xn, preferred_element_type=jnp.float32) + b1_ref[...]
    h = jnp.maximum(h, 0.0)                                 # (64, tile_n)

    # ---- Linear(64 -> 1, no bias): VPU multiply + sublane reduce (kept off the MXU).
    out = jnp.sum(h * w2_ref[...], axis=0, keepdims=True)   # (1, tile_n), lane-dense
    o_ref[...] = out.astype(o_ref.dtype)


def mlp2_policy_forward(params, constraint_features, edge_indices, edge_features,
                        variable_features, *, tile_n=1024):
    # Only variable_features is used, matching the PyTorch forward.
    del constraint_features, edge_indices, edge_features

    N, F = variable_features.shape
    assert F == VAR_NFEATS

    # Fold the LayerNorm affine into the first Linear (exact algebraic identity):
    #   (xn*gamma + beta) @ W1 + b1  ==  xn @ (gamma[:,None]*W1) + (beta @ W1 + b1)
    gamma = params["ln_gamma"].astype(jnp.float32)           # (19,)
    beta = params["ln_beta"].astype(jnp.float32)             # (19,)
    w1 = params["w1"].astype(jnp.float32)                    # (19, 64)
    b1 = params["b1"].astype(jnp.float32)                    # (64,)
    w2 = params["w2"].astype(jnp.float32)                    # (64, 1)

    w1_eff = (gamma[:, None] * w1).T                         # (64, 19), feature-major
    b1_eff = (beta @ w1 + b1).reshape(EMB_SIZE, 1)           # (64, 1)
    w2_col = w2.reshape(EMB_SIZE, 1)                         # (64, 1)

    # Pad the ragged tail to a multiple of tile_n, then go feature-major (19, n_pad).
    n_pad = pl.cdiv(N, tile_n) * tile_n
    x = variable_features.astype(jnp.float32)
    if n_pad != N:
        x = jnp.pad(x, ((0, n_pad - N), (0, 0)))             # zero rows: LN is finite on them
    xt = x.T                                                 # (19, n_pad) — layout plumbing

    out = pl.pallas_call(
        mlp2_policy_kernel,
        out_shape=jax.ShapeDtypeStruct((1, n_pad), jnp.float32),
        grid_spec=pltpu.PrefetchScalarGridSpec(
            num_scalar_prefetch=0,
            grid=(n_pad // tile_n,),
            in_specs=[
                pl.BlockSpec((VAR_NFEATS, tile_n), lambda i: (0, i)),   # x tile (feature-major)
                pl.BlockSpec((EMB_SIZE, VAR_NFEATS), lambda i: (0, 0)), # W1' (LN affine folded)
                pl.BlockSpec((EMB_SIZE, 1), lambda i: (0, 0)),          # b1'
                pl.BlockSpec((EMB_SIZE, 1), lambda i: (0, 0)),          # w2
            ],
            out_specs=pl.BlockSpec((1, tile_n), lambda i: (0, i)),      # lane-dense output row
        ),
        compiler_params=pltpu.CompilerParams(
            dimension_semantics=("parallel",),   # megacore-shard the row-tile axis on v7x
        ),
    )(xt, w1_eff, b1_eff, w2_col)

    return out.reshape(n_pad)[:N]                # (N,), matching .squeeze(-1)


def init_params(key):
    k1, k2, k3 = jax.random.split(key, 3)
    # torch.nn.LayerNorm default init: gamma = 1, beta = 0
    ln_gamma = jnp.ones((VAR_NFEATS,), jnp.float32)
    ln_beta = jnp.zeros((VAR_NFEATS,), jnp.float32)
    # torch.nn.Linear-like init (uniform in +/- 1/sqrt(fan_in)), deterministic via PRNGKey
    bound1 = 1.0 / jnp.sqrt(float(VAR_NFEATS))
    w1 = jax.random.uniform(k1, (VAR_NFEATS, EMB_SIZE), jnp.float32, -bound1, bound1)
    b1 = jax.random.uniform(k2, (EMB_SIZE,), jnp.float32, -bound1, bound1)
    bound2 = 1.0 / jnp.sqrt(float(EMB_SIZE))
    w2 = jax.random.uniform(k3, (EMB_SIZE, 1), jnp.float32, -bound2, bound2)
    return {"ln_gamma": ln_gamma, "ln_beta": ln_beta, "w1": w1, "b1": b1, "w2": w2}


def reference_forward(params, variable_features):
    x = variable_features.astype(jnp.float32)
    mean = jnp.mean(x, axis=-1, keepdims=True)
    var = jnp.mean((x - mean) ** 2, axis=-1, keepdims=True)
    xn = (x - mean) / jnp.sqrt(var + LN_EPS)
    y = xn * params["ln_gamma"] + params["ln_beta"]
    h = jnp.maximum(y @ params["w1"] + params["b1"], 0.0)
    return (h @ params["w2"]).squeeze(-1)


if __name__ == "__main__":
    key = jax.random.PRNGKey(0)
    kp, kv, kc, ke = jax.random.split(key, 4)

    params = init_params(kp)

    # Small shapes consistent with the module: N variables x 19 features.
    # N deliberately NOT a multiple of tile_n to exercise the ragged-tail padding.
    N = 3000
    variable_features = jax.random.normal(kv, (N, VAR_NFEATS), jnp.float32)
    # Unused-by-forward inputs (present only to mirror the module signature).
    constraint_features = jax.random.normal(kc, (32, 5), jnp.float32)
    edge_indices = jnp.zeros((2, 16), jnp.int32)
    edge_features = jax.random.normal(ke, (16, 1), jnp.float32)

    out = mlp2_policy_forward(params, constraint_features, edge_indices,
                              edge_features, variable_features, tile_n=1024)
    out = jax.block_until_ready(out)

    ref = reference_forward(params, variable_features)
    assert out.shape == (N,)
    assert jnp.allclose(out, ref, atol=1e-4, rtol=1e-4), "mismatch vs pure-JAX reference"

    print("KERNEL_OK")
</pallas_src>

<mosaic_0001>
module attributes {stable_mosaic.version = 11 : i64} {
  func.func @mlp2_policy_kernel(%arg0: i32, %arg1: memref<19x1024xf32, #tpu.memory_space<vmem>>, %arg2: memref<64x19xf32, #tpu.memory_space<vmem>>, %arg3: memref<64x1xf32, #tpu.memory_space<vmem>>, %arg4: memref<64x1xf32, #tpu.memory_space<vmem>>, %arg5: memref<1x1024xf32, #tpu.memory_space<vmem>>) attributes {dimension_semantics = [#tpu.dimension_semantics<parallel>], iteration_bounds = array<i64: 3>, scalar_prefetch = 0 : i64, scratch_operands = 0 : i64, tpu.core_type = #tpu.core_type<tc>, window_params = [{transform_indices = @transform_0, window_bounds = array<i64: 19, 1024>}, {pipeline_mode = #tpu.pipeline_mode<synchronous>, transform_indices = @transform_1, window_bounds = array<i64: 64, 19>}, {pipeline_mode = #tpu.pipeline_mode<synchronous>, transform_indices = @transform_2, window_bounds = array<i64: 64, 1>}, {pipeline_mode = #tpu.pipeline_mode<synchronous>, transform_indices = @transform_3, window_bounds = array<i64: 64, 1>}, {transform_indices = @transform_4, window_bounds = array<i64: 1, 1024>}]} {
    %c0 = arith.constant 0 : index
    %c0_0 = arith.constant 0 : index
    %0 = vector.load %arg1[%c0, %c0_0] : memref<19x1024xf32, #tpu.memory_space<vmem>>, vector<19x1024xf32>
    %cst = arith.constant dense<0.000000e+00> : vector<1024xf32>
    %1 = vector.multi_reduction <add>, %0, %cst [0] : vector<19x1024xf32> to vector<1024xf32>
    %2 = vector.shape_cast %1 : vector<1024xf32> to vector<1x1024xf32>
    %cst_1 = arith.constant 1.900000e+01 : f32
    %3 = vector.broadcast %cst_1 : f32 to vector<1x1024xf32>
    %4 = arith.divf %2, %3 : vector<1x1024xf32>
    %5 = vector.broadcast %4 : vector<1x1024xf32> to vector<19x1024xf32>
    %6 = arith.subf %0, %5 : vector<19x1024xf32>
    %7 = arith.mulf %6, %6 : vector<19x1024xf32>
    %cst_2 = arith.constant dense<0.000000e+00> : vector<1024xf32>
    %8 = vector.multi_reduction <add>, %7, %cst_2 [0] : vector<19x1024xf32> to vector<1024xf32>
    %9 = vector.shape_cast %8 : vector<1024xf32> to vector<1x1024xf32>
    %cst_3 = arith.constant 1.900000e+01 : f32
    %10 = vector.broadcast %cst_3 : f32 to vector<1x1024xf32>
    %11 = arith.divf %9, %10 : vector<1x1024xf32>
    %cst_4 = arith.constant 9.99999974E-6 : f32
    %12 = vector.broadcast %cst_4 : f32 to vector<1x1024xf32>
    %13 = arith.addf %11, %12 : vector<1x1024xf32>
    %14 = math.rsqrt %13 : vector<1x1024xf32>
    %15 = vector.broadcast %14 : vector<1x1024xf32> to vector<19x1024xf32>
    %16 = arith.mulf %6, %15 : vector<19x1024xf32>
    %c0_5 = arith.constant 0 : index
    %c0_6 = arith.constant 0 : index
    %17 = vector.load %arg2[%c0_5, %c0_6] : memref<64x19xf32, #tpu.memory_space<vmem>>, vector<64x19xf32>
    %cst_7 = arith.constant dense<0.000000e+00> : vector<64x1024xf32>
    %18 = tpu.matmul %17, %16, %cst_7 {dimension_numbers = #tpu.dot_dimension_numbers<[1], [0], [0], [1], [0, 0, 1, 1], [], []>} : vector<64x19xf32>, vector<19x1024xf32>, vector<64x1024xf32> -> vector<64x1024xf32>
    %c0_8 = arith.constant 0 : index
    %c0_9 = arith.constant 0 : index
    %19 = vector.load %arg3[%c0_8, %c0_9] : memref<64x1xf32, #tpu.memory_space<vmem>>, vector<64x1xf32>
    %20 = vector.broadcast %19 : vector<64x1xf32> to vector<64x1024xf32>
    %21 = arith.addf %18, %20 : vector<64x1024xf32>
    %cst_10 = arith.constant 0.000000e+00 : f32
    %22 = vector.broadcast %cst_10 : f32 to vector<64x1024xf32>
    %23 = arith.maximumf %21, %22 : vector<64x1024xf32>
    %c0_11 = arith.constant 0 : index
    %c0_12 = arith.constant 0 : index
    %24 = vector.load %arg4[%c0_11, %c0_12] : memref<64x1xf32, #tpu.memory_space<vmem>>, vector<64x1xf32>
    %25 = vector.broadcast %24 : vector<64x1xf32> to vector<64x1024xf32>
    %26 = arith.mulf %23, %25 : vector<64x1024xf32>
    %cst_13 = arith.constant dense<0.000000e+00> : vector<1024xf32>
    %27 = vector.multi_reduction <add>, %26, %cst_13 [0] : vector<64x1024xf32> to vector<1024xf32>
    %28 = vector.shape_cast %27 : vector<1024xf32> to vector<1x1024xf32>
    %c0_14 = arith.constant 0 : index
    %c0_15 = arith.constant 0 : index
    %29 = vector.load %arg5[%c0_14, %c0_15] : memref<1x1024xf32, #tpu.memory_space<vmem>>, vector<1x1024xf32>
    tpu.vector_store %arg5[%c0_14, %c0_15], %28 {strides = array<i32>} : memref<1x1024xf32, #tpu.memory_space<vmem>>, vector<1x1024xf32>,
    return
  }
  func.func @transform_0(%arg0: i32) -> (i32, i32) {
    %c0_i32 = arith.constant 0 : i32
    %c0_i32_0 = arith.constant 0 : i32
    return %c0_i32, %arg0 : i32, i32
  }
  func.func @transform_1(%arg0: i32) -> (i32, i32) {
    %c0_i32 = arith.constant 0 : i32
    %c0_i32_0 = arith.constant 0 : i32
    %c0_i32_1 = arith.constant 0 : i32
    return %c0_i32, %c0_i32_0 : i32, i32
  }
  func.func @transform_2(%arg0: i32) -> (i32, i32) {
    %c0_i32 = arith.constant 0 : i32
    %c0_i32_0 = arith.constant 0 : i32
    %c0_i32_1 = arith.constant 0 : i32
    return %c0_i32, %c0_i32_0 : i32, i32
  }
  func.func @transform_3(%arg0: i32) -> (i32, i32) {
    %c0_i32 = arith.constant 0 : i32
    %c0_i32_0 = arith.constant 0 : i32
    %c0_i32_1 = arith.constant 0 : i32
    return %c0_i32, %c0_i32_0 : i32, i32
  }
  func.func @transform_4(%arg0: i32) -> (i32, i32) {
    %c0_i32 = arith.constant 0 : i32
    %c0_i32_0 = arith.constant 0 : i32
    return %c0_i32, %arg0 : i32, i32
  }
}

</mosaic_0001>

<bundles_post_ra>
// kernel: tpu_custom_call.1
= control target key start
LH: loop header
LB: loop body
LE: loop exit
PB: predicated region body
PF: predicated region fallthrough
CT: control target
= control target key end

     0   :  { %9 = vsyncpa [#allocation3], 0  ;;  %s2477_s0 = inlined_call_operand.hbm [shape: f32[19,3072], index: 0, kind: input, shape index: {}]   ;;  %s2478_s1 = inlined_call_operand.vmem [shape: f32[64,19], index: 1, kind: input, shape index: {}]   ;;  %s2479_s2 = inlined_call_operand.vmem [shape: f32[64,1], index: 2, kind: input, shape index: {}]   ;;  %s2480_s3 = inlined_call_operand.vmem [shape: f32[64,1], index: 3, kind: input, shape index: {}]   ;;  %s2481_s4 = inlined_call_operand.hbm [shape: f32[1,3072], index: 4, kind: output, shape index: {}]  }
   0x1   :  { %11 = vsyncpa [#allocation3 + $0x1], 0 }
   0x2   :  { %12 = vsyncpa [#allocation4], 0 }
   0x3   :  { %14 = vsyncpa [#allocation4 + $0x1], 0  ;;  %s1726_s15 = smov 0   ;;  %s1728_s16 = smov 0  }
   0x4   :  { %s1730_s17 = smov 0   ;;  %s1732_s18 = smov 0  }
   0x5 LB: > { %s1747_s19 = sadd.s32 4294967295, %s1691_s18   ;;  %s1473_s20 = sadd.s32 4294967294, %s1691_s18   ;;  %s1691_s18 = sphi %s1732_s18, %s2495_s18   ;;  %s1687_s17 = sphi %s1730_s17, %s2494_s17   ;;  %s1683_s16 = sphi %s1728_s16, %s2493_s16   ;;  %s1679_s15 = sphi %s1726_s15, %s2492_s15  }
   0x6   : > { %s1751_s21 = sadd.s32 1, %s1691_s18   ;;  %s27_s22 = sadd.s32 1, %s1687_s17 }
   0x7   : > { %s24_s23 = ssub.s32 %s1691_s18, %s1751_s21  ;;  %p34_p0 = scmp.ne.s32.totalorder %s1687_s17, %s1683_s16 }
   0x8   : > { %p25_p1 = scmp.eq.s32.totalorder %s24_s23, 0  ;;  %p35_p2 = scmp.eq.s32.totalorder %s1691_s18, 0 }
   0x9   : > { %p40_p3 = scmp.ne.s32.totalorder %s1683_s16, %s1679_s15  ;;  %p41_p4 = scmp.eq.s32.totalorder %s1747_s19, 0 }
   0xa   : > { %s1763_s24 = scalar_select %p25_p1, %s1687_s17, %s27_s22  }
   0xb   : > { %p36_p5 = por %p35_p2, %p34_p0  ;;  %p1765_p6 = por %p41_p4, %p40_p3 }
   0xc   : > { %p127_p7 = scmp.eq.s32.totalorder %s1747_s19, 2  ;;  %p133_p8 = scmp.eq.s32.totalorder %s1473_s20, 2 }
   0xd   : > { %s2484_s25 = scalar_select %p1765_p6, 1, 0 }
   0xe   : > { %p1541_p9 = scmp.lt.s32.totalorder %s1691_s18, 3  ;;  %p1771_p10 = por %p127_p7, %p34_p0 }
   0xf   : > { %p1775_p11 = por %p133_p8, %p40_p3  ;;  %s162_s28 = sand.u32 1, %s1687_s17  }
  0x10   : > { %s2485_s26 = scalar_select %p1771_p10, 1, 0 }
  0x11   : > { %s2486_s27 = scalar_select %p1775_p11, 1, 0 }
  0x12   : > { %s1525_s29 = sshll.u32 %s1691_s18, 10  ;;  %s1527_s30 = smul.u32 192, %s162_s28 }
  0x13   : > { %s1784_s7 = scalar_lea.hbm %s2477_s0, %s1525_s29  ;;  %p1786_p12 = pnand %p1541_p9, %p36_p5 }
  0x14   : > { %s166_s9 = scalar_lea.vmem [#allocation2], %s1527_s30  ;;  %s1793_s11 = scalar_lea.sflag [#allocation3], %s162_s28 }
  0x15   : > { %s173_s10 = sshll.u32 %s166_s9, 4  ;;  %s1599_s12 = scalar_lea.hbm %s1784_s7, 3072  ;;  %s1790_s10 = int_to_ptr.vmem [resolvable:$true] %s173_s10 }
  0x16   : > { %p1600_p0 = scmp.ne.s32.totalorder %s1784_s7, %s1599_s12  ;;  %p1601_p1 = pneg %p1786_p12 }
  0x17   : > { %s1604_s20 = scalar_lea.hbm %s2477_s0, 9216  ;;  %p1605_p4 = scmp.lt.s32.totalorder %s1784_s7, %s2477_s0 }
  0x18   : > { %p1602_p2 = pnand %p1601_p1, %p1600_p0  ;;  %p1606_p5 = scmp.lt.s32.totalorder %s1604_s20, %s1599_s12 }
  0x1a   : > { %p1603_p3 = pneg %p1602_p2  ;;  %p1607_p7 = por %p1606_p5, %p1605_p4 }
  0x1c   : > { %p1608_p8 = pnand %p1607_p7, %p1603_p3 }
  0x1e   : > { %1611 = shalt.err (!%p1608_p8)
}
  0x1f   : > { %s1612_s28 = scalar_lea.vmem %s1790_s10, 3072  ;;  %s1693_s29 = smov [#allocation2]  }
  0x20   : > { %p1613_p9 = scmp.ne.s32.totalorder %s1790_s10, %s1612_s28  ;;  %s1617_s30 = sshll.u32 %s1693_s29, 4  ;;  %s1618_s30 = int_to_ptr.vmem [resolvable:$false] %s1617_s30 }
  0x21   : > { %s1619_s5 = scalar_lea.vmem %s1618_s30, 6144  ;;  %p1620_p2 = scmp.lt.s32.totalorder %s1790_s10, %s1618_s30 }
  0x22   : > { %p1615_p13 = pnand %p1613_p9, %p1601_p1  ;;  %p1621_p11 = scmp.lt.s32.totalorder %s1619_s5, %s1612_s28 }
  0x24   : > { %p1616_p0 = pneg %p1615_p13  ;;  %p1622_p10 = por %p1621_p11, %p1620_p2 }
  0x26   : > { %p1623_p6 = pnand %p1622_p10, %p1616_p0 }
  0x28   : > { %1626 = shalt.err (!%p1623_p6)
}
  0x29   : > { %s1694_s6 = smov 3072   ;;  %s1695_s9 = smov 1024  }
  0x2a   : > { %s1696_s12 = smov 64   ;;  %p181_p13 = scmp.lt.s32.totalorder %s1691_s18, 4 }
  0x2b   : > { %1536 = dma.hbm_to_vmem [thread:$0]  (!%p1786_p12), %s1784_s7, 3072, %s1790_s10, %s1793_s11, %s1694_s6, %s1695_s9, %s1696_s12  }
  0x2c   : > { %p2488_p1 = scmp.ge.s32.totalorder %s1691_s18, 1 }
  0x2e   : > { %p182_p3 = pnand %p2488_p1, %p181_p13 }
  0x2f   : > { %s1818_s13 = sand.u32 (!%p182_p3), 1, %s1683_s16   ;;  %p2489_p6 = scmp.ne.s32.totalorder (!%p182_p3), %s2484_s25, 0 }
  0x30   : > { %185 = sbr.rel (%p182_p3) target bundleno = 425 (0x1a9), region = 36  ;;  %s188_s20 = scalar_lea.sflag (!%p182_p3), [#allocation3], %s1818_s13 }
  0x31   : > { %s1528_s14 = smul.u32 (!%p182_p3), 192, %s1818_s13 }
  0x33   : > { %s1822_s22 = scalar_lea.vmem (!%p182_p3), [#allocation2], %s1528_s14 }
  0x35   : > { %1670 = dma.done.wait (%p2489_p6), %s188_s20, 3072  }
  0x36   : > { %1672 = vsyncadd (%p2489_p6), %s188_s20, 4294964224  ;;  %v1697_v0 = vmov 0.0   ;;  %vm243_vm0 = vcmask 1042432   ;;  %v1831_v1 = vld [vmem:[%s1822_s22 + $0x8] sm:$0xff]  ;;  %v1844_v6 = vld [vmem:[%s1822_s22 + $0x18] sm:$0xff]  ;;  %v1698_v20 = vmov 0  }
  0x37   : > { %661 = vmatprep.mubr.f32.mxu0 %v1697_v0  ;;  %774 = vmatprep.mubr.f32.mxu1 %v1697_v0  ;;  %v1834_v2 = vld [vmem:[%s1822_s22 + $0x48] sm:$0xff]  ;;  %v1847_v7 = vld [vmem:[%s1822_s22 + $0x58] sm:$0xff]  ;;  %v1857_v11 = vld [vmem:[%s1822_s22] sm:$0xff]  ;;  %vm548_vm1 = vcmask 154624   ;;  %s1479_s25 = sshll.u32 %s1818_s13, 3  ;;  %s1526_s7 = sshll.u32 %s1747_s19, 7 }
  0x38   : > { %v1837_v3 = vld [vmem:[%s1822_s22 + $0x88] sm:$0x7]  ;;  %v252_v4 = vadd.f32 %v1834_v2, %v1831_v1  ;;  %v1850_v8 = vld [vmem:[%s1822_s22 + $0x98] sm:$0x7]  ;;  %v270_v9 = vadd.f32 %v1847_v7, %v1844_v6  ;;  %v1860_v12 = vld [vmem:[%s1822_s22 + $0x40] sm:$0xff]  ;;  %1581 = vset.pattern.permute.xlu0 %v1698_v20  ;;  %1582 = vset.pattern.permute.xlu1 %v1698_v20  ;;  %s215_s8 = scalar_lea.vmem [#allocation5], %s1479_s25  ;;  %s1401_s28 = scalar_lea.hbm %s2481_s4, %s1526_s7 }
  0x39   : > { %v253_v5 = vsel %vm243_vm0, %v1837_v3, 0.0  ;;  %v271_v10 = vsel %vm243_vm0, %v1850_v8, 0.0  ;;  %v1863_v13 = vld [vmem:[%s1822_s22 + $0x80] sm:$0x7]  ;;  %v242_v15 = vadd.f32 %v1860_v12, %v1857_v11  ;;  %v1870_v17 = vld [vmem:[%s1822_s22 + $0x10] sm:$0xff]  ;;  %v1883_v24 = vld [vmem:[%s1822_s22 + $0x28] sm:$0xff] }
  0x3a   : > { %v254_v14 = vadd.f32 %v253_v5, %v252_v4  ;;  %v244_v16 = vsel %vm243_vm0, %v1863_v13, 0.0  ;;  %v1873_v18 = vld [vmem:[%s1822_s22 + $0x50] sm:$0xff]  ;;  %v272_v21 = vadd.f32 %v271_v10, %v270_v9  ;;  %v1886_v25 = vld [vmem:[%s1822_s22 + $0x68] sm:$0xff]  ;;  %v1894_v30 = vld [vmem:[%s1822_s22 + $0x38] sm:$0xff]  ;;  %s1403_s10 = sshll.u32 %s215_s8, 4  ;;  %s1389_s29 = scalar_lea.sflag [#allocation4], %s1818_s13  ;;  %s1404_s10 = int_to_ptr.vmem [resolvable:$true] %s1403_s10 }
  0x3b   : > { %v1876_v19 = vld [vmem:[%s1822_s22 + $0x90] sm:$0x7]  ;;  %v261_v22 = vadd.f32 %v1873_v18, %v1870_v17  ;;  %v245_v27 = vadd.f32 %v244_v16, %v242_v15  ;;  %v1889_v28 = vld [vmem:[%s1822_s22 + $0xa8] sm:$0x7]  ;;  %v288_v29 = vadd.f32 %v1886_v25, %v1883_v24  ;;  %v1897_v31 = vld [vmem:[%s1822_s22 + $0x78] sm:$0xff]  ;;  %s1627_s30 = scalar_lea.vmem %s1404_s10, 128 }
  0x3c   : > { %v262_v23 = vsel %vm243_vm0, %v1876_v19, 0.0  ;;  %v255_v26 = vrot.slane %v254_v14, 4  ;;  %v273_v32 = vrot.slane %v272_v21, 4  ;;  %v289_v34 = vsel %vm243_vm0, %v1889_v28, 0.0  ;;  %v1902_v35 = vld [vmem:[%s1822_s22 + $0xb8] sm:$0x7]  ;;  %p1628_p10 = scmp.ne.s32.totalorder %s1404_s10, %s1627_s30 }
  0x3d   : > { %v263_v33 = vadd.f32 %v262_v23, %v261_v22  ;;  %v306_v36 = vadd.f32 %v1897_v31, %v1894_v30  ;;  %v1907_v37 = vld [vmem:[%s1822_s22 + $0x20] sm:$0xff]  ;;  %v246_v40 = vrot.slane %v245_v27, 4  ;;  %v290_v41 = vadd.f32 %v289_v34, %v288_v29  ;;  %v1920_v48 = vld [vmem:[%s1822_s22 + $0x30] sm:$0xff]  ;;  %v501_v15 = vld [vmem:[%s2479_s2 + $0x8] sm:$0xff]  ;;  %p2490_p11 = scmp.ne.s32.totalorder %s2485_s26, 0  ;;  %s1700_s5 = smov [#allocation5]  }
  0x3e   : > { %v1910_v38 = vld [vmem:[%s1822_s22 + $0x60] sm:$0xff]  ;;  %v256_v39 = vadd.f32 %v255_v26, %v254_v14  ;;  %v307_v42 = vsel %vm243_vm0, %v1902_v35, 0.0  ;;  %v274_v44 = vadd.f32 %v273_v32, %v272_v21  ;;  %v1923_v49 = vld [vmem:[%s1822_s22 + $0x70] sm:$0xff]  ;;  %v503_v23 = vld [vmem:[%s2479_s2 + $0x18] sm:$0xff]  ;;  %s1631_s6 = sshll.u32 %s1700_s5, 4  ;;  %s1632_s6 = int_to_ptr.vmem [resolvable:$false] %s1631_s6 }
  0x3f   : > { %v1915_v43 = vld [vmem:[%s1822_s22 + $0xa0] sm:$0x7]  ;;  %v264_v45 = vrot.slane %v263_v33, 4  ;;  %v308_v46 = vadd.f32 %v307_v42, %v306_v36  ;;  %v279_v47 = vadd.f32 %v1910_v38, %v1907_v37  ;;  %v247_v51 = vadd.f32 %v246_v40, %v245_v27  ;;  %v1928_v58 = vld [vmem:[%s1822_s22 + $0xb0] sm:$0x7]  ;;  %p1629_p12 = pnand %p1628_p10, %p2490_p11  ;;  %s1633_s19 = scalar_lea.vmem %s1632_s6, 256 }
  0x40   : > { %v257_v50 = vrot.slane %v256_v39, 2  ;;  %v291_v52 = vrot.slane %v290_v41, 4  ;;  %v280_v53 = vsel %vm243_vm0, %v1915_v43, 0.0  ;;  %v275_v54 = vrot.slane %v274_v44, 2  ;;  %v500_v59 = vld [vmem:[%s2479_s2] sm:$0xff]  ;;  %v502_v4 = vld [vmem:[%s2479_s2 + $0x10] sm:$0xff]  ;;  %p1634_p5 = scmp.lt.s32.totalorder %s1404_s10, %s1632_s6  ;;  %p1635_p7 = scmp.lt.s32.totalorder %s1633_s19, %s1627_s30 }
  0x41   : > { %v265_v55 = vadd.f32 %v264_v45, %v263_v33  ;;  %v309_v56 = vrot.slane %v308_v46, 4  ;;  %v281_v57 = vadd.f32 %v280_v53, %v279_v47  ;;  %v248_v61 = vrot.slane %v247_v51, 2  ;;  %510 = vperm.xlu0 %1581, %v500_v59   ;;  %520 = vperm.xlu1 %1582, %v502_v4   ;;  %v1113_v45 = vld [vmem:[%s2480_s3] sm:$0xff]  ;;  %p1630_p4 = pneg %p1629_p12 }
  0x42   : > { %v258_v60 = vadd.f32 %v257_v50, %v256_v39  ;;  %v292_v62 = vadd.f32 %v291_v52, %v290_v41  ;;  %v297_v63 = vadd.f32 %v1923_v49, %v1920_v48  ;;  %v276_v5 = vadd.f32 %v275_v54, %v274_v44  ;;  %v1114_v52 = vld [vmem:[%s2480_s3 + $0x8] sm:$0xff]  ;;  %p1636_p8 = por %p1635_p7, %p1634_p5 }
  0x43   : > { %v266_v9 = vrot.slane %v265_v55, 2  ;;  %v310_v10 = vadd.f32 %v309_v56, %v308_v46  ;;  %v282_v14 = vrot.slane %v281_v57, 4  ;;  %v249_v20 = vadd.f32 %v248_v61, %v247_v51 }
  0x44   : > { %v259_v16 = vrot.slane %v258_v60, 1  ;;  %v293_v21 = vrot.slane %v292_v62, 2  ;;  %v298_v22 = vsel %vm243_vm0, %v1928_v58, 0.0  ;;  %v277_v26 = vrot.slane %v276_v5, 1  ;;  %p1637_p9 = pnand %p1636_p8, %p1630_p4 }
  0x45   : > { %v267_v27 = vadd.f32 %v266_v9, %v265_v55  ;;  %v311_v29 = vrot.slane %v310_v10, 2  ;;  %v283_v32 = vadd.f32 %v282_v14, %v281_v57  ;;  %v250_v34 = vrot.slane %v249_v20, 1  ;;  %515 = vperm.xlu0 %1581, %v501_v15   ;;  %525 = vperm.xlu1 %1582, %v503_v23  }
  0x46   : > { %v260_v33 = vadd.f32 %v259_v16, %v258_v60  ;;  %v294_v36 = vadd.f32 %v293_v21, %v292_v62  ;;  %v1946_v39 = vadd.f32 %v298_v22, %v297_v63  ;;  %v278_v40 = vadd.f32 %v277_v26, %v276_v5 }
  0x47   : > { %v268_v41 = vrot.slane %v267_v27, 1  ;;  %v312_v42 = vadd.f32 %v311_v29, %v310_v10  ;;  %v284_v44 = vrot.slane %v283_v32, 2  ;;  %v251_v47 = vadd.f32 %v250_v34, %v249_v20 }
  0x48   : > { %v317_v46 = vmul.f32 0.05263158, %v260_v33  ;;  %v295_v50 = vrot.slane %v294_v36, 1  ;;  %v300_v51 = vrot.slane %v1946_v39, 4  ;;  %v319_v53 = vmul.f32 0.05263158, %v278_v40 }
  0x49   : > { %v269_v54 = vadd.f32 %v268_v41, %v267_v27  ;;  %v313_v55 = vrot.slane %v312_v42, 1  ;;  %v1955_v56 = vadd.f32 %v284_v44, %v283_v32  ;;  %v316_v61 = vmul.f32 0.05263158, %v251_v47  ;;  %1123 = vperm.xlu0 %1581, %v1113_v45   ;;  %1128 = vperm.xlu1 %1582, %v1114_v52  }
  0x4a   : > { %v1958_v57 = vsub.f32 %v1831_v1, %v317_v46  ;;  %v1961_v59 = vsub.f32 %v1834_v2, %v317_v46  ;;  %v1964_v60 = vsub.f32 %v1837_v3, %v317_v46  ;;  %v1967_v62 = vsub.f32 %v1844_v6, %v319_v53  ;;  %v504_v1 = vld [vmem:[%s2479_s2 + $0x20] sm:$0xff] }
  0x4b   : > { %v1970_v63 = vsub.f32 %v1847_v7, %v319_v53  ;;  %v1973_v4 = vsub.f32 %v1850_v8, %v319_v53  ;;  %v318_v5 = vmul.f32 0.05263158, %v269_v54  ;;  %v1985_v7 = vsub.f32 %v1857_v11, %v316_v61  ;;  %v1115_v8 = vld [vmem:[%s2480_s3 + $0x10] sm:$0xff] }
  0x4c   : > { %v349_v2 = vmul.f32 %v1958_v57, %v1958_v57  ;;  %v357_v3 = vmul.f32 %v1961_v59, %v1961_v59  ;;  %v365_v6 = vmul.f32 %v1964_v60, %v1964_v60  ;;  %v351_v9 = vmul.f32 %v1967_v62, %v1967_v62 }
  0x4d   : > { %v359_v10 = vmul.f32 %v1970_v63, %v1970_v63  ;;  %v367_v14 = vmul.f32 %v1973_v4, %v1973_v4  ;;  %v1997_v15 = vsub.f32 %v1860_v12, %v316_v61  ;;  %v2001_v20 = vsub.f32 %v1863_v13, %v316_v61  ;;  %530 = vperm.xlu0 %1581, %v504_v1   ;;  %v505_v12 = vld [vmem:[%s2479_s2 + $0x28] sm:$0xff]  ;;  %v506_v61 = vld [vmem:[%s2479_s2 + $0x30] sm:$0xff] }
  0x4e   : > { %v381_v16 = vadd.f32 %v357_v3, %v349_v2  ;;  %v382_v11 = vsel %vm243_vm0, %v365_v6, 0.0  ;;  %v348_v21 = vmul.f32 %v1985_v7, %v1985_v7  ;;  %v2009_v27 = vsub.f32 %v1870_v17, %v318_v5  ;;  %1133 = vperm.xlu1 %1582, %v1115_v8   ;;  %v1116_v17 = vld [vmem:[%s2480_s3 + $0x18] sm:$0xff]  ;;  %v1117_v2 = vld [vmem:[%s2480_s3 + $0x20] sm:$0xff] }
  0x4f   : > { %v399_v22 = vadd.f32 %v359_v10, %v351_v9  ;;  %v400_v23 = vsel %vm243_vm0, %v367_v14, 0.0  ;;  %v356_v26 = vmul.f32 %v1997_v15, %v1997_v15  ;;  %v364_v29 = vmul.f32 %v2001_v20, %v2001_v20 }
  0x50   : > { %v383_v13 = vadd.f32 %v382_v11, %v381_v16  ;;  %v2017_v32 = vsub.f32 %v1873_v18, %v318_v5  ;;  %v2020_v33 = vsub.f32 %v1876_v19, %v318_v5  ;;  %v350_v41 = vmul.f32 %v2009_v27, %v2009_v27 }
  0x51   : > { %v401_v34 = vadd.f32 %v400_v23, %v399_v22  ;;  %v372_v40 = vadd.f32 %v356_v26, %v348_v21  ;;  %v296_v44 = vadd.f32 %v295_v50, %v294_v36  ;;  %v373_v46 = vsel %vm243_vm0, %v364_v29, 0.0  ;;  %535 = vperm.xlu0 %1581, %v505_v12   ;;  %v1118_v12 = vld [vmem:[%s2480_s3 + $0x28] sm:$0xff] }
  0x52   : > { %v384_v45 = vrot.slane %v383_v13, 4  ;;  %v358_v18 = vmul.f32 %v2017_v32, %v2017_v32  ;;  %v366_v19 = vmul.f32 %v2020_v33, %v2020_v33  ;;  %v314_v54 = vadd.f32 %v313_v55, %v312_v42  ;;  %1138 = vperm.xlu1 %1582, %v1116_v17  }
  0x53   : > { %v402_v47 = vrot.slane %v401_v34, 4  ;;  %v374_v52 = vadd.f32 %v373_v46, %v372_v40  ;;  %v321_v53 = vmul.f32 0.05263158, %v296_v44  ;;  %v286_v1 = vrot.slane %v1955_v56, 1 }
  0x54   : > { %v385_v36 = vadd.f32 %v384_v45, %v383_v13  ;;  %v390_v50 = vadd.f32 %v358_v18, %v350_v41  ;;  %v391_v5 = vsel %vm243_vm0, %v366_v19, 0.0  ;;  %v323_v14 = vmul.f32 0.05263158, %v314_v54  ;;  %v1120_v54 = vld [vmem:[%s2480_s3 + $0x38] sm:$0xff] }
  0x55   : > { %v403_v3 = vadd.f32 %v402_v47, %v401_v34  ;;  %v375_v6 = vrot.slane %v374_v52, 4  ;;  %v2041_v8 = vsub.f32 %v1883_v24, %v321_v53  ;;  %v2044_v42 = vsub.f32 %v1886_v25, %v321_v53  ;;  %540 = vperm.xlu0 %1581, %v506_v61   ;;  %v507_v24 = vld [vmem:[%s2479_s2 + $0x38] sm:$0xff] }
  0x56   : > { %v386_v55 = vrot.slane %v385_v36, 2  ;;  %v392_v9 = vadd.f32 %v391_v5, %v390_v50  ;;  %v2047_v10 = vsub.f32 %v1889_v28, %v321_v53  ;;  %1143 = vperm.xlu1 %1582, %v1117_v2   ;;  %v2059_v26 = vsub.f32 %v1894_v30, %v323_v14 }
  0x57   : > { %v404_v16 = vrot.slane %v403_v3, 2  ;;  %v376_v11 = vadd.f32 %v375_v6, %v374_v52  ;;  %v353_v21 = vmul.f32 %v2041_v8, %v2041_v8  ;;  %v361_v22 = vmul.f32 %v2044_v42, %v2044_v42 }
  0x58   : > { %v387_v25 = vadd.f32 %v386_v55, %v385_v36  ;;  %v393_v23 = vrot.slane %v392_v9, 4  ;;  %v369_v28 = vmul.f32 %v2047_v10, %v2047_v10  ;;  %v2065_v34 = vsub.f32 %v1897_v31, %v323_v14  ;;  %v1119_v31 = vld [vmem:[%s2480_s3 + $0x30] sm:$0xff] }
  0x59   : > { %v405_v13 = vadd.f32 %v404_v16, %v403_v3  ;;  %v377_v29 = vrot.slane %v376_v11, 2  ;;  %v417_v17 = vadd.f32 %v361_v22, %v353_v21  ;;  %v2069_v45 = vsub.f32 %v1902_v35, %v323_v14  ;;  %545 = vperm.xlu0 %1581, %v507_v24  }
  0x5a   : > { %v388_v40 = vrot.slane %v387_v25, 1  ;;  %v394_v41 = vadd.f32 %v393_v23, %v392_v9  ;;  %v418_v44 = vsel %vm243_vm0, %v369_v28, 0.0  ;;  %v355_v19 = vmul.f32 %v2059_v26, %v2059_v26  ;;  %1148 = vperm.xlu1 %1582, %v1118_v12  }
  0x5b   : > { %v406_v30 = vrot.slane %v405_v13, 1  ;;  %v378_v46 = vadd.f32 %v377_v29, %v376_v11  ;;  %v419_v18 = vadd.f32 %v418_v44, %v417_v17  ;;  %v363_v53 = vmul.f32 %v2065_v34, %v2065_v34 }
  0x5c   : > { %v389_v47 = vadd.f32 %v388_v40, %v387_v25  ;;  %v395_v52 = vrot.slane %v394_v41, 2  ;;  %v371_v35 = vmul.f32 %v2069_v45, %v2069_v45  ;;  %v287_v5 = vadd.f32 %v286_v1, %v1955_v56 }
  0x5d   : > { %v407_v61 = vadd.f32 %v406_v30, %v405_v13  ;;  %v379_v36 = vrot.slane %v378_v46, 1  ;;  %v420_v50 = vrot.slane %v419_v18, 4  ;;  %v435_v6 = vadd.f32 %v363_v53, %v355_v19  ;;  %1153 = vperm.xlu0 %1581, %v1119_v31  }
  0x5e   : > { %v445_v2 = vmul.f32 0.05263158, %v389_v47  ;;  %v396_v3 = vadd.f32 %v395_v52, %v394_v41  ;;  %v436_v55 = vsel %vm243_vm0, %v371_v35, 0.0  ;;  %v320_v11 = vmul.f32 0.05263158, %v287_v5  ;;  %1158 = vperm.xlu1 %1582, %v1120_v54  }
  0x5f   : > { %v447_v9 = vmul.f32 0.05263158, %v407_v61  ;;  %v380_v14 = vadd.f32 %v379_v36, %v378_v46  ;;  %v421_v16 = vadd.f32 %v420_v50, %v419_v18  ;;  %v437_v24 = vadd.f32 %v436_v55, %v435_v6 }
  0x60   : > { %v453_v21 = vadd.f32 1e-05, %v445_v2  ;;  %v397_v22 = vrot.slane %v396_v3, 1  ;;  %v301_v25 = vadd.f32 %v300_v51, %v1946_v39  ;;  %v2089_v28 = vsub.f32 %v1907_v37, %v320_v11 }
  0x61   : > { %v455_v23 = vadd.f32 1e-05, %v447_v9  ;;  %v444_v56 = vmul.f32 0.05263158, %v380_v14  ;;  %v422_v1 = vrot.slane %v421_v16, 2  ;;  %v438_v13 = vrot.slane %v437_v24, 4 }
  0x62   : > { %1583 = vrsqrt.f32 %v453_v21  ;;  %v398_v12 = vadd.f32 %v397_v22, %v396_v3  ;;  %v2092_v29 = vsub.f32 %v1910_v38, %v320_v11  ;;  %v2095_v41 = vsub.f32 %v1915_v43, %v320_v11 }
  0x63   : > { %1585 = vrsqrt.f32 %v455_v23  ;;  %v452_v17 = vadd.f32 1e-05, %v444_v56  ;;  %v423_v40 = vadd.f32 %v422_v1, %v421_v16  ;;  %v439_v39 = vadd.f32 %v438_v13, %v437_v24 }
  0x64   : > { %v446_v44 = vmul.f32 0.05263158, %v398_v12  ;;  %v352_v51 = vmul.f32 %v2089_v28, %v2089_v28  ;;  %v360_v37 = vmul.f32 %v2092_v29, %v2092_v29  ;;  %v368_v38 = vmul.f32 %v2095_v41, %v2095_v41 }
  0x65   : > { %1587 = vrsqrt.f32 %v452_v17  ;;  %v424_v30 = vrot.slane %v423_v40, 1  ;;  %v302_v46 = vrot.slane %v301_v25, 2  ;;  %v440_v19 = vrot.slane %v439_v39, 2 }
  0x66   : > { %v454_v18 = vadd.f32 1e-05, %v446_v44  ;;  %v408_v31 = vadd.f32 %v360_v37, %v352_v51  ;;  %v409_v43 = vsel %vm243_vm0, %v368_v38, 0.0 }
  0x67   : > { %v425_v47 = vadd.f32 %v424_v30, %v423_v40  ;;  %v303_v52 = vadd.f32 %v302_v46, %v301_v25  ;;  %v441_v53 = vadd.f32 %v440_v19, %v439_v39  ;;  %v2137_v46 = vld [vmem:[%s2478_s1] sm:$0xff] }
  0x68   : > { %1589 = vrsqrt.f32 %v454_v18  ;;  %v410_v35 = vadd.f32 %v409_v43, %v408_v31 }
  0x69   : > { %v449_v54 = vmul.f32 0.05263158, %v425_v47  ;;  %v304_v61 = vrot.slane %v303_v52, 1  ;;  %v442_v36 = vrot.slane %v441_v53, 1 }
  0x6a   : > { %v411_v50 = vrot.slane %v410_v35, 4 }
  0x6b   : > { %v457_v5 = vadd.f32 1e-05, %v449_v54  ;;  %v305_v2 = vadd.f32 %v304_v61, %v303_v52  ;;  %v443_v3 = vadd.f32 %v442_v36, %v441_v53  ;;  %v2161_v53 = vld [vmem:[%s2478_s1 + $0x10] sm:$0xff] }
  0x6c   : > { %v412_v6 = vadd.f32 %v411_v50, %v410_v35 }
  0x6d   : > { %1591 = vrsqrt.f32 %v457_v5  ;;  %v322_v55 = vmul.f32 0.05263158, %v305_v2  ;;  %v451_v9 = vmul.f32 0.05263158, %v443_v3  ;;  %v496_v3 = vld [vmem:[%s2478_s1 + $0x20] sm:$0xff] }
  0x6e   : > { %v413_v14 = vrot.slane %v412_v6, 2 }
  0x6f   : > { %v1584_v16 = vpop.eup %1583  ;;  %v2105_v11 = vsub.f32 %v1920_v48, %v322_v55  ;;  %v2108_v21 = vsub.f32 %v1923_v49, %v322_v55  ;;  %v2111_v22 = vsub.f32 %v1928_v58, %v322_v55  ;;  %v459_v23 = vadd.f32 1e-05, %v451_v9 }
  0x70   : > { %v1586_v24 = vpop.eup %1585  ;;  %v485_v25 = vmul.f32 %v1584_v16, %v1964_v60  ;;  %v477_v1 = vmul.f32 %v1584_v16, %v1961_v59  ;;  %v414_v12 = vadd.f32 %v413_v14, %v412_v6  ;;  %v469_v17 = vmul.f32 %v1584_v16, %v1958_v57 }
  0x71   : > { %v487_v56 = vmul.f32 %v1586_v24, %v1973_v4  ;;  %1593 = vrsqrt.f32 %v459_v23  ;;  %v354_v48 = vmul.f32 %v2105_v11, %v2105_v11  ;;  %v362_v49 = vmul.f32 %v2108_v21, %v2108_v21 }
  0x72   : > { %v1588_v13 = vpop.eup %1587  ;;  %1480 = vmatprep.subr.msk.mxu0 %vm243_vm0, %v485_v25  ;;  %v370_v58 = vmul.f32 %v2111_v22, %v2111_v22  ;;  %v415_v4 = vrot.slane %v414_v12, 1  ;;  %v479_v51 = vmul.f32 %v1586_v24, %v1970_v63  ;;  %v471_v57 = vmul.f32 %v1586_v24, %v1967_v62 }
  0x73   : > { %1490 = vmatprep.subr.msk.mxu1 %vm243_vm0, %v487_v56  ;;  %v484_v60 = vmul.f32 %v1588_v13, %v2001_v20  ;;  %v476_v59 = vmul.f32 %v1588_v13, %v1997_v15  ;;  %v426_v40 = vadd.f32 %v362_v49, %v354_v48  ;;  %v468_v37 = vmul.f32 %v1588_v13, %v1985_v7 }
  0x74   : > { %v427_v44 = vsel %vm243_vm0, %v370_v58, 0.0  ;;  %v416_v30 = vadd.f32 %v415_v4, %v414_v12 }
  0x75   : > { %v1590_v39 = vpop.eup %1589  ;;  %1481 = vmatpush1.msk.msra.mxu0 %vm243_vm0, %v484_v60  ;;  %v428_v15 = vadd.f32 %v427_v44, %v426_v40 }
  0x76   : > { %v486_v38 = vmul.f32 %v1590_v39, %v2020_v33  ;;  %625 = vmatprep.subr.mxu0 %v477_v1  ;;  %v478_v20 = vmul.f32 %v1590_v39, %v2017_v32  ;;  %v448_v18 = vmul.f32 0.05263158, %v416_v30  ;;  %v470_v63 = vmul.f32 %v1590_v39, %v2009_v27  ;;  %v2148_v27 = vld [vmem:[%s2478_s1 + $0x8] sm:$0xff] }
  0x77   : > { %626 = vmatpush1.msra.mxu0 %v476_v59  ;;  %v429_v7 = vrot.slane %v428_v15, 4 }
  0x78   : > { %1491 = vmatpush1.msk.msra.mxu1 %vm243_vm0, %v486_v38  ;;  %627 = vmatprep.subr.mxu0 %v469_v17  ;;  %v456_v32 = vadd.f32 1e-05, %v448_v18 }
  0x79   : > { %738 = vmatprep.subr.mxu1 %v479_v51  ;;  %628 = vmatpush1.msra.mxu0 %v468_v37  ;;  %v430_v62 = vadd.f32 %v429_v7, %v428_v15 }
  0x7a   : > { %v1592_v33 = vpop.eup %1591  ;;  %739 = vmatpush1.msra.mxu1 %v478_v20  ;;  %1482 = vmatmul.mubr.msk.f32.vlgmr.msra.gmra.mxu0 %vm548_vm1, %v2137_v46  ;;  %1595 = vrsqrt.f32 %v456_v32 }
  0x7b   : > { %740 = vmatprep.subr.mxu1 %v471_v57  ;;  %v489_v19 = vmul.f32 %v1592_v33, %v2047_v10  ;;  %667 = vmatprep.mubr.f32.mxu0 %v1697_v0  ;;  %v431_v31 = vrot.slane %v430_v62, 2  ;;  %v481_v50 = vmul.f32 %v1592_v33, %v2044_v42  ;;  %v473_v6 = vmul.f32 %v1592_v33, %v2041_v8  ;;  %v497_v42 = vld [vmem:[%s2478_s1 + $0x28] sm:$0xff]  ;;  %v498_v8 = vld [vmem:[%s2478_s1 + $0x30] sm:$0xff] }
  0x7c   : > { %741 = vmatpush1.msra.mxu1 %v470_v63 }
  0x7d   : > { %1492 = vmatmul.mubr.msk.f32.vlgmr.msra.gmra.mxu1 %vm548_vm1, %v2137_v46  ;;  %1500 = vmatprep.subr.msk.mxu0 %vm243_vm0, %v489_v19  ;;  %v432_v47 = vadd.f32 %v431_v31, %v430_v62 }
  0x7e   : > { %780 = vmatprep.mubr.f32.mxu1 %v1697_v0  ;;  %1483 = vmatmul.mubr.msk.f32.gmra.mxu0 %vm548_vm1, %v2148_v27  ;;  %v1594_v10 = vpop.eup %1593 }
  0x7f   : > { %673 = vmatprep.mubr.f32.mxu0 %v1697_v0  ;;  %v491_v43 = vmul.f32 %v1594_v10, %v2069_v45  ;;  %v433_v52 = vrot.slane %v432_v47, 1  ;;  %v2173_v45 = vld [vmem:[%s2478_s1 + $0x18] sm:$0xff]  ;;  %v483_v55 = vmul.f32 %v1594_v10, %v2065_v34  ;;  %v475_v16 = vmul.f32 %v1594_v10, %v2059_v26 }
  0x81   : > { %1493 = vmatmul.mubr.msk.f32.gmra.mxu1 %vm548_vm1, %v2148_v27  ;;  %1510 = vmatprep.subr.msk.mxu1 %vm243_vm0, %v491_v43  ;;  %v434_v35 = vadd.f32 %v433_v52, %v432_v47 }
  0x82   : > { %786 = vmatprep.mubr.f32.mxu1 %v1697_v0  ;;  %1484 = vmatmul.mubr.msk.f32.gmra.mxu0 %vm548_vm1, %v2161_v53 }
  0x83   : > { %v450_v54 = vmul.f32 0.05263158, %v434_v35  ;;  %679 = vmatprep.mubr.f32.mxu0 %v1697_v0 }
  0x85   : > { %1494 = vmatmul.mubr.msk.f32.gmra.mxu1 %vm548_vm1, %v2161_v53  ;;  %v458_v61 = vadd.f32 1e-05, %v450_v54 }
  0x86   : > { %792 = vmatprep.mubr.f32.mxu1 %v1697_v0  ;;  %1485 = vmatmul.mubr.msk.f32.gmra.mxu0 %vm548_vm1, %v2173_v45 }
  0x87   : > { %v1596_v36 = vpop.eup %1595  ;;  %1597 = vrsqrt.f32 %v458_v61  ;;  %685 = vmatprep.mubr.f32.mxu0 %v1697_v0 }
  0x88   : > { %v488_v5 = vmul.f32 %v1596_v36, %v2095_v41  ;;  %v480_v2 = vmul.f32 %v1596_v36, %v2092_v29  ;;  %v472_v29 = vmul.f32 %v1596_v36, %v2089_v28  ;;  %v499_v28 = vld [vmem:[%s2478_s1 + $0x38] sm:$0xff] }
  0x89   : > { %1495 = vmatmul.mubr.msk.f32.gmra.mxu1 %vm548_vm1, %v2173_v45 }
  0x8a   : > { %798 = vmatprep.mubr.f32.mxu1 %v1697_v0  ;;  %1501 = vmatpush1.msk.msra.mxu0 %vm243_vm0, %v488_v5 }
  0x8b   : > { %851 = vmatprep.subr.mxu0 %v481_v50  ;;  %1486 = vmatmul.mubr.msk.f32.gmra.mxu0 %vm548_vm1, %v496_v3 }
  0x8c   : > { %852 = vmatpush1.msra.mxu0 %v480_v2  ;;  %691 = vmatprep.mubr.f32.mxu0 %v1697_v0 }
  0x8d   : > { %1496 = vmatmul.mubr.msk.f32.gmra.mxu1 %vm548_vm1, %v496_v3  ;;  %853 = vmatprep.subr.mxu0 %v473_v6 }
  0x8e   : > { %804 = vmatprep.mubr.f32.mxu1 %v1697_v0  ;;  %854 = vmatpush1.msra.mxu0 %v472_v29 }
  0x8f   : > { %1487 = vmatmul.mubr.msk.f32.gmra.mxu0 %vm548_vm1, %v497_v42 }
  0x90   : > { %697 = vmatprep.mubr.f32.mxu0 %v1697_v0 }
  0x91   : > { %1497 = vmatmul.mubr.msk.f32.gmra.mxu1 %vm548_vm1, %v497_v42 }
  0x92   : > { %810 = vmatprep.mubr.f32.mxu1 %v1697_v0 }
  0x93   : > { %1488 = vmatmul.mubr.msk.f32.gmra.mxu0 %vm548_vm1, %v498_v8 }
  0x94   : > { %v1598_v41 = vpop.eup %1597  ;;  %703 = vmatprep.mubr.f32.mxu0 %v1697_v0 }
  0x95   : > { %1498 = vmatmul.mubr.msk.f32.gmra.mxu1 %vm548_vm1, %v498_v8  ;;  %v490_v9 = vmul.f32 %v1598_v41, %v2111_v22  ;;  %v482_v14 = vmul.f32 %v1598_v41, %v2108_v21  ;;  %v474_v34 = vmul.f32 %v1598_v41, %v2105_v11 }
  0x96   : > { %816 = vmatprep.mubr.f32.mxu1 %v1697_v0 }
  0x97   : > { %1511 = vmatpush1.msk.msra.mxu1 %vm243_vm0, %v490_v9  ;;  %1489 = vmatmul.mubr.msk.f32.gmra.mxu0 %vm548_vm1, %v499_v28 }
  0x98   : > { %964 = vmatprep.subr.mxu1 %v483_v55  ;;  %887 = vmatprep.mubr.f32.mxu0 %v1697_v0 }
  0x99   : > { %1499 = vmatmul.mubr.msk.f32.gmra.mxu1 %vm548_vm1, %v499_v28 }
  0x9a   : > { %965 = vmatpush1.msra.mxu1 %v482_v14  ;;  %1000 = vmatprep.mubr.f32.mxu1 %v1697_v0 }
  0x9b   : > { %966 = vmatprep.subr.mxu1 %v475_v16  ;;  %1502 = vmatmul.mubr.msk.f32.vlgmr.msra.gmra.mxu0 %vm548_vm1, %v2137_v46 }
  0x9c   : > { %967 = vmatpush1.msra.mxu1 %v474_v34  ;;  %893 = vmatprep.mubr.f32.mxu0 %v1697_v0 }
  0x9d   : > { %1512 = vmatmul.mubr.msk.f32.vlgmr.msra.gmra.mxu1 %vm548_vm1, %v2137_v46 }
  0x9e   : > { %1006 = vmatprep.mubr.f32.mxu1 %v1697_v0 }
  0x9f   : > { %1503 = vmatmul.mubr.msk.f32.gmra.mxu0 %vm548_vm1, %v2148_v27 }
  0xa0   : > { %899 = vmatprep.mubr.f32.mxu0 %v1697_v0 }
  0xa1   : > { %1513 = vmatmul.mubr.msk.f32.gmra.mxu1 %vm548_vm1, %v2148_v27 }
  0xa2   : > { %1012 = vmatprep.mubr.f32.mxu1 %v1697_v0 }
  0xa3   : > { %1504 = vmatmul.mubr.msk.f32.gmra.mxu0 %vm548_vm1, %v2161_v53 }
  0xa4   : > { %905 = vmatprep.mubr.f32.mxu0 %v1697_v0 }
  0xa5   : > { %1514 = vmatmul.mubr.msk.f32.gmra.mxu1 %vm548_vm1, %v2161_v53 }
  0xa6   : > { %1018 = vmatprep.mubr.f32.mxu1 %v1697_v0 }
  0xa7   : > { %1505 = vmatmul.mubr.msk.f32.gmra.mxu0 %vm548_vm1, %v2173_v45 }
  0xa8   : > { %911 = vmatprep.mubr.f32.mxu0 %v1697_v0 }
  0xa9   : > { %1515 = vmatmul.mubr.msk.f32.gmra.mxu1 %vm548_vm1, %v2173_v45 }
  0xaa   : > { %1024 = vmatprep.mubr.f32.mxu1 %v1697_v0 }
  0xab   : > { %1506 = vmatmul.mubr.msk.f32.gmra.mxu0 %vm548_vm1, %v496_v3 }
  0xac   : > { %917 = vmatprep.mubr.f32.mxu0 %v1697_v0 }
  0xad   : > { %1516 = vmatmul.mubr.msk.f32.gmra.mxu1 %vm548_vm1, %v496_v3 }
  0xae   : > { %1030 = vmatprep.mubr.f32.mxu1 %v1697_v0 }
  0xaf   : > { %1507 = vmatmul.mubr.msk.f32.gmra.mxu0 %vm548_vm1, %v497_v42 }
  0xb0   : > { %923 = vmatprep.mubr.f32.mxu0 %v1697_v0 }
  0xb1   : > { %1517 = vmatmul.mubr.msk.f32.gmra.mxu1 %vm548_vm1, %v497_v42 }
  0xb2   : > { %1036 = vmatprep.mubr.f32.mxu1 %v1697_v0 }
  0xb3   : > { %1508 = vmatmul.mubr.msk.f32.gmra.mxu0 %vm548_vm1, %v498_v8 }
  0xb4   : > { %929 = vmatprep.mubr.f32.mxu0 %v1697_v0 }
  0xb5   : > { %1518 = vmatmul.mubr.msk.f32.gmra.mxu1 %vm548_vm1, %v498_v8 }
  0xb6   : > { %1042 = vmatprep.mubr.f32.mxu1 %v1697_v0 }
  0xb7   : > { %1509 = vmatmul.mubr.msk.f32.gmra.mxu0 %vm548_vm1, %v499_v28 }
  0xb9   : > { %1519 = vmatmul.mubr.msk.f32.gmra.mxu1 %vm548_vm1, %v499_v28 }
  0xbc   : > { %v2262_v26 = vpop.permute.xlu0 %510  ;;  %v2264_v11 = vpop.permute.xlu1 %520 }
  0xc0   : > { %v2266_v21 = vpop.permute.xlu0 %515  ;;  %v2268_v22 = vpop.permute.xlu1 %525 }
  0xc4   : > { %v2270_v24 = vpop.permute.xlu0 %1123  ;;  %v2272_v23 = vpop.permute.xlu1 %1128 }
  0xc8   : > { %v2276_v48 = vpop.permute.xlu0 %530 }
  0xc9   : > { %v2281_v17 = vpop.permute.xlu1 %1133 }
  0xcc   : > { %v2288_v33 = vpop.permute.xlu0 %535 }
  0xcd   : > { %v2295_v35 = vpop.permute.xlu1 %1138 }
 0x13a   : > { %v663_v25 = vpop.f32.mrf.mxu0 }
 0x13b   : > { %v664_v0 = vadd.f32 %v663_v25, %v2262_v26 }
 0x13c   : > { %v665_v56 = vpop.f32.mrf.mxu0 }
 0x13d   : > { %v776_v1 = vpop.f32.mrf.mxu1  ;;  %v666_v12 = vadd.f32 %v665_v56, %v2262_v26  ;;  %v1049_v40 = vmax.f32 %v664_v0, 0.0  ;;  %v2306_v56 = vpop.permute.xlu0 %540 }
 0x13e   : > { %v669_v13 = vpop.f32.mrf.mxu0  ;;  %v777_v49 = vadd.f32 %v776_v1, %v2262_v26 }
 0x13f   : > { %v778_v58 = vpop.f32.mrf.mxu1  ;;  %v670_v60 = vadd.f32 %v669_v13, %v2266_v21  ;;  %v1050_v44 = vmax.f32 %v666_v12, 0.0  ;;  %v1161_v62 = vmul.f32 %v2270_v24, %v1049_v40 }
 0x140   : > { %v779_v59 = vadd.f32 %v778_v58, %v2262_v26  ;;  %v671_v4 = vpop.f32.mrf.mxu0  ;;  %v1051_v38 = vmax.f32 %v777_v49, 0.0 }
 0x141   : > { %v1057_v39 = vmax.f32 %v670_v60, 0.0  ;;  %v782_v51 = vpop.f32.mrf.mxu1  ;;  %v672_v37 = vadd.f32 %v671_v4, %v2266_v21  ;;  %v1162_v19 = vmul.f32 %v2270_v24, %v1050_v44  ;;  %v2312_v44 = vpop.permute.xlu1 %1143 }
 0x142   : > { %v783_v30 = vadd.f32 %v782_v51, %v2266_v21  ;;  %v1052_v20 = vmax.f32 %v779_v59, 0.0  ;;  %v675_v18 = vpop.f32.mrf.mxu0  ;;  %v1163_v54 = vmul.f32 %v2270_v24, %v1051_v38 }
 0x143   : > { %v1058_v15 = vmax.f32 %v672_v37, 0.0  ;;  %v784_v57 = vpop.f32.mrf.mxu1  ;;  %v1169_v46 = vmul.f32 %v2272_v23, %v1057_v39  ;;  %v676_v32 = vadd.f32 %v675_v18, %v2264_v11 }
 0x144   : > { %v1059_v63 = vmax.f32 %v783_v30, 0.0  ;;  %v785_v7 = vadd.f32 %v784_v57, %v2266_v21  ;;  %v677_v47 = vpop.f32.mrf.mxu0  ;;  %v1164_v45 = vmul.f32 %v2270_v24, %v1052_v20 }
 0x145   : > { %v1170_v27 = vmul.f32 %v2272_v23, %v1058_v15  ;;  %v788_v31 = vpop.f32.mrf.mxu1  ;;  %v1065_v52 = vmax.f32 %v676_v32, 0.0  ;;  %v1225_v61 = vadd.f32 %v1169_v46, %v1161_v62  ;;  %v678_v36 = vadd.f32 %v677_v47, %v2264_v11 }
 0x146   : > { %v1060_v10 = vmax.f32 %v785_v7, 0.0  ;;  %v1171_v43 = vmul.f32 %v2272_v23, %v1059_v63  ;;  %v789_v53 = vadd.f32 %v788_v31, %v2264_v11  ;;  %v681_v5 = vpop.f32.mrf.mxu0 }
 0x147   : > { %v790_v50 = vpop.f32.mrf.mxu1  ;;  %v1238_v3 = vadd.f32 %v1170_v27, %v1162_v19  ;;  %v1066_v8 = vmax.f32 %v678_v36, 0.0  ;;  %v1177_v41 = vmul.f32 %v2281_v17, %v1065_v52  ;;  %v682_v55 = vadd.f32 %v681_v5, %v2268_v22  ;;  %v2322_v52 = vpop.permute.xlu0 %545 }
 0x148   : > { %v1172_v2 = vmul.f32 %v2272_v23, %v1060_v10  ;;  %v1067_v6 = vmax.f32 %v789_v53, 0.0  ;;  %v791_v42 = vadd.f32 %v790_v50, %v2264_v11  ;;  %v1251_v29 = vadd.f32 %v1171_v43, %v1163_v54  ;;  %v683_v9 = vpop.f32.mrf.mxu0 }
 0x149   : > { %v794_v28 = vpop.f32.mrf.mxu1  ;;  %v1178_v0 = vmul.f32 %v2281_v17, %v1066_v8  ;;  %v1226_v1 = vadd.f32 %v1225_v61, %v1177_v41  ;;  %v1073_v12 = vmax.f32 %v682_v55, 0.0  ;;  %v684_v13 = vadd.f32 %v683_v9, %v2268_v22 }
 0x14a   : > { %v1264_v14 = vadd.f32 %v1172_v2, %v1164_v45  ;;  %v1068_v16 = vmax.f32 %v791_v42, 0.0  ;;  %v1179_v34 = vmul.f32 %v2281_v17, %v1067_v6  ;;  %v795_v25 = vadd.f32 %v794_v28, %v2268_v22  ;;  %v2328_v42 = vpop.permute.xlu1 %1148 }
 0x14b   : > { %v796_v49 = vpop.f32.mrf.mxu1  ;;  %v687_v40 = vpop.f32.mrf.mxu0  ;;  %v1239_v39 = vadd.f32 %v1238_v3, %v1178_v0  ;;  %v1074_v51 = vmax.f32 %v684_v13, 0.0  ;;  %v1185_v37 = vmul.f32 %v2295_v35, %v1073_v12 }
 0x14c   : > { %v1180_v58 = vmul.f32 %v2281_v17, %v1068_v16  ;;  %v1252_v60 = vadd.f32 %v1251_v29, %v1179_v34  ;;  %v1075_v59 = vmax.f32 %v795_v25, 0.0  ;;  %v797_v4 = vadd.f32 %v796_v49, %v2268_v22 }
 0x14d   : > { %v688_v30 = vadd.f32 %v687_v40, %v2276_v48  ;;  %v800_v38 = vpop.f32.mrf.mxu1  ;;  %v689_v18 = vpop.f32.mrf.mxu0  ;;  %v1186_v63 = vmul.f32 %v2295_v35, %v1074_v51  ;;  %v1227_v7 = vadd.f32 %v1226_v1, %v1185_v37 }
 0x14e   : > { %v1265_v20 = vadd.f32 %v1264_v14, %v1180_v58  ;;  %v1076_v15 = vmax.f32 %v797_v4, 0.0  ;;  %v1187_v57 = vmul.f32 %v2295_v35, %v1075_v59  ;;  %v801_v46 = vadd.f32 %v800_v38, %v2276_v48  ;;  %v2338_v40 = vpop.permute.xlu0 %1153 }
 0x14f   : > { %v1081_v32 = vmax.f32 %v688_v30, 0.0  ;;  %v690_v62 = vadd.f32 %v689_v18, %v2276_v48  ;;  %v802_v19 = vpop.f32.mrf.mxu1  ;;  %v693_v43 = vpop.f32.mrf.mxu0  ;;  %v1240_v53 = vadd.f32 %v1239_v39, %v1186_v63 }
 0x150   : > { %v1188_v27 = vmul.f32 %v2295_v35, %v1076_v15  ;;  %v1253_v31 = vadd.f32 %v1252_v60, %v1187_v57  ;;  %v1083_v47 = vmax.f32 %v801_v46, 0.0  ;;  %v803_v10 = vadd.f32 %v802_v19, %v2276_v48 }
 0x151   : > { %v1082_v54 = vmax.f32 %v690_v62, 0.0  ;;  %v1193_v45 = vmul.f32 %v2312_v44, %v1081_v32  ;;  %v694_v61 = vadd.f32 %v693_v43, %v2288_v33  ;;  %v806_v36 = vpop.f32.mrf.mxu1  ;;  %v695_v6 = vpop.f32.mrf.mxu0 }
 0x152   : > { %v1266_v50 = vadd.f32 %v1265_v20, %v1188_v27  ;;  %v1084_v5 = vmax.f32 %v803_v10, 0.0  ;;  %v1195_v2 = vmul.f32 %v2312_v44, %v1083_v47  ;;  %v807_v3 = vadd.f32 %v806_v36, %v2288_v33 }
 0x153   : > { %v1194_v29 = vmul.f32 %v2312_v44, %v1082_v54  ;;  %v1089_v8 = vmax.f32 %v694_v61, 0.0  ;;  %v696_v41 = vadd.f32 %v695_v6, %v2288_v33  ;;  %v808_v55 = vpop.f32.mrf.mxu1  ;;  %v1228_v28 = vadd.f32 %v1227_v7, %v1193_v45  ;;  %v699_v34 = vpop.f32.mrf.mxu0 }
 0x154   : > { %v1196_v9 = vmul.f32 %v2312_v44, %v1084_v5  ;;  %v1091_v14 = vmax.f32 %v807_v3, 0.0  ;;  %v809_v16 = vadd.f32 %v808_v55, %v2288_v33  ;;  %v1254_v25 = vadd.f32 %v1253_v31, %v1195_v2  ;;  %v2348_v54 = vpop.permute.xlu1 %1158 }
 0x155   : > { %v1090_v0 = vmax.f32 %v696_v41, 0.0  ;;  %v1201_v1 = vmul.f32 %v2328_v42, %v1089_v8  ;;  %v700_v12 = vadd.f32 %v699_v34, %v2306_v56  ;;  %v812_v13 = vpop.f32.mrf.mxu1  ;;  %v1241_v49 = vadd.f32 %v1240_v53, %v1194_v29  ;;  %v701_v4 = vpop.f32.mrf.mxu0 }
 0x156   : > { %v1092_v58 = vmax.f32 %v809_v16, 0.0  ;;  %v1203_v60 = vmul.f32 %v2328_v42, %v1091_v14  ;;  %v813_v59 = vadd.f32 %v812_v13, %v2306_v56  ;;  %v1267_v39 = vadd.f32 %v1266_v50, %v1196_v9 }
 0x157   : > { %v1202_v51 = vmul.f32 %v2328_v42, %v1090_v0  ;;  %v1097_v37 = vmax.f32 %v700_v12, 0.0  ;;  %v702_v30 = vadd.f32 %v701_v4, %v2306_v56  ;;  %v814_v38 = vpop.f32.mrf.mxu1  ;;  %v1229_v20 = vadd.f32 %v1228_v28, %v1201_v1  ;;  %v705_v63 = vpop.f32.mrf.mxu0 }
 0x158   : > { %v1204_v15 = vmul.f32 %v2328_v42, %v1092_v58  ;;  %v1099_v57 = vmax.f32 %v813_v59, 0.0  ;;  %v815_v46 = vadd.f32 %v814_v38, %v2306_v56  ;;  %v1255_v18 = vadd.f32 %v1254_v25, %v1203_v60 }
 0x159   : > { %v1098_v7 = vmax.f32 %v702_v30, 0.0  ;;  %v1209_v32 = vmul.f32 %v2338_v40, %v1097_v37  ;;  %v1242_v62 = vadd.f32 %v1241_v49, %v1202_v51  ;;  %v706_v19 = vadd.f32 %v705_v63, %v2322_v52  ;;  %v818_v27 = vpop.f32.mrf.mxu1  ;;  %v707_v53 = vpop.f32.mrf.mxu0 }
 0x15a   : > { %v1100_v31 = vmax.f32 %v815_v46, 0.0  ;;  %v1211_v47 = vmul.f32 %v2338_v40, %v1099_v57  ;;  %v1268_v10 = vadd.f32 %v1267_v39, %v1204_v15  ;;  %v819_v43 = vadd.f32 %v818_v27, %v2322_v52 }
 0x15b   : > { %v1210_v45 = vmul.f32 %v2338_v40, %v1098_v7  ;;  %v1230_v61 = vadd.f32 %v1229_v20, %v1209_v32  ;;  %v1105_v36 = vmax.f32 %v706_v19, 0.0  ;;  %v708_v50 = vadd.f32 %v707_v53, %v2322_v52  ;;  %v820_v5 = vpop.f32.mrf.mxu1  ;;  %v889_v8 = vpop.f32.mrf.mxu0 }
 0x15c   : > { %v1212_v2 = vmul.f32 %v2338_v40, %v1100_v31  ;;  %v1256_v3 = vadd.f32 %v1255_v18, %v1211_v47  ;;  %v1107_v6 = vmax.f32 %v819_v43, 0.0  ;;  %v821_v29 = vadd.f32 %v820_v5, %v2322_v52 }
 0x15d   : > { %v1243_v41 = vadd.f32 %v1242_v62, %v1210_v45  ;;  %v1106_v55 = vmax.f32 %v708_v50, 0.0  ;;  %v1217_v28 = vmul.f32 %v2348_v54, %v1105_v36  ;;  %v890_v9 = vadd.f32 %v889_v8, %v2262_v26  ;;  %v1002_v14 = vpop.f32.mrf.mxu1  ;;  %v891_v1 = vpop.f32.mrf.mxu0 }
 0x15e   : > { %v1269_v16 = vadd.f32 %v1268_v10, %v1212_v2  ;;  %v1108_v34 = vmax.f32 %v821_v29, 0.0  ;;  %v1219_v25 = vmul.f32 %v2348_v54, %v1107_v6  ;;  %v1003_v0 = vadd.f32 %v1002_v14, %v2262_v26 }
 0x15f   : > { %v1218_v12 = vmul.f32 %v2348_v54, %v1106_v55  ;;  %v1231_v13 = vadd.f32 %v1230_v61, %v1217_v28  ;;  %v1053_v49 = vmax.f32 %v890_v9, 0.0  ;;  %v892_v58 = vadd.f32 %v891_v1, %v2262_v26  ;;  %v1004_v60 = vpop.f32.mrf.mxu1  ;;  %v895_v37 = vpop.f32.mrf.mxu0 }
 0x160   : > { %v1220_v59 = vmul.f32 %v2348_v54, %v1108_v34  ;;  %v1257_v4 = vadd.f32 %v1256_v3, %v1219_v25  ;;  %v1055_v39 = vmax.f32 %v1003_v0, 0.0  ;;  %v1005_v51 = vadd.f32 %v1004_v60, %v2262_v26 }
 0x161   : > { %v1232_v30 = vrot.slane %v1231_v13, 4  ;;  %v1244_v38 = vadd.f32 %v1243_v41, %v1218_v12  ;;  %v1054_v20 = vmax.f32 %v892_v58, 0.0  ;;  %v1008_v15 = vpop.f32.mrf.mxu1  ;;  %v897_v63 = vpop.f32.mrf.mxu0  ;;  %v1165_v62 = vmul.f32 %v2270_v24, %v1053_v49 }
 0x162   : > { %v1258_v57 = vrot.slane %v1257_v4, 4  ;;  %v1270_v46 = vadd.f32 %v1269_v16, %v1220_v59  ;;  %v1056_v18 = vmax.f32 %v1005_v51, 0.0  ;;  %v896_v19 = vadd.f32 %v895_v37, %v2266_v21 }
 0x163   : > { %v2362_v7 = vadd.f32 %v1232_v30, %v1231_v13  ;;  %v1245_v32 = vrot.slane %v1244_v38, 4  ;;  %v1010_v27 = vpop.f32.mrf.mxu1  ;;  %v1167_v47 = vmul.f32 %v2270_v24, %v1055_v39  ;;  %v1009_v10 = vadd.f32 %v1008_v15, %v2266_v21  ;;  %v901_v43 = vpop.f32.mrf.mxu0 }
 0x164   : > { %v2366_v31 = vadd.f32 %v1258_v57, %v1257_v4  ;;  %v1271_v26 = vrot.slane %v1270_v46, 4  ;;  %v1166_v45 = vmul.f32 %v2270_v24, %v1054_v20  ;;  %v1061_v61 = vmax.f32 %v896_v19, 0.0 }
 0x165   : > { %v1246_v53 = vadd.f32 %v1245_v32, %v1244_v38  ;;  %v898_v36 = vadd.f32 %v897_v63, %v2266_v21  ;;  %v1014_v50 = vpop.f32.mrf.mxu1  ;;  %v1168_v2 = vmul.f32 %v2270_v24, %v1056_v18  ;;  %v1063_v3 = vmax.f32 %v1009_v10, 0.0  ;;  %v903_v29 = vpop.f32.mrf.mxu0 }
 0x166   : > { %v1272_v5 = vadd.f32 %v1271_v26, %v1270_v46  ;;  %v1011_v6 = vadd.f32 %v1010_v27, %v2266_v21  ;;  %v1234_v8 = vrot.slane %v2362_v7, 2  ;;  %v1173_v55 = vmul.f32 %v2272_v23, %v1061_v61 }
 0x167   : > { %v1247_v41 = vrot.slane %v1246_v53, 2  ;;  %v1062_v28 = vmax.f32 %v898_v36, 0.0  ;;  %v1016_v9 = vpop.f32.mrf.mxu1  ;;  %v1260_v14 = vrot.slane %v2366_v31, 2  ;;  %v1175_v34 = vmul.f32 %v2272_v23, %v1063_v3  ;;  %v907_v0 = vpop.f32.mrf.mxu0 }
 0x168   : > { %v1273_v16 = vrot.slane %v1272_v5, 2  ;;  %v1064_v25 = vmax.f32 %v1011_v6, 0.0  ;;  %v1277_v24 = vadd.f32 %v1173_v55, %v1165_v62  ;;  %v902_v12 = vadd.f32 %v901_v43, %v2264_v11 }
 0x169   : > { %v2378_v1 = vadd.f32 %v1247_v41, %v1246_v53  ;;  %v1174_v21 = vmul.f32 %v2272_v23, %v1062_v28  ;;  %v1020_v13 = vpop.f32.mrf.mxu1  ;;  %v1303_v58 = vadd.f32 %v1175_v34, %v1167_v47  ;;  %v1015_v59 = vadd.f32 %v1014_v50, %v2264_v11  ;;  %v909_v4 = vpop.f32.mrf.mxu0 }
 0x16a   : > { %v2382_v49 = vadd.f32 %v1273_v16, %v1272_v5  ;;  %v1176_v60 = vmul.f32 %v2272_v23, %v1064_v25  ;;  %v1069_v51 = vmax.f32 %v902_v12, 0.0  ;;  %v904_v37 = vadd.f32 %v903_v29, %v2264_v11 }
 0x16b   : > { %v1290_v39 = vadd.f32 %v1174_v21, %v1166_v45  ;;  %v1017_v30 = vadd.f32 %v1016_v9, %v2264_v11  ;;  %v1022_v38 = vpop.f32.mrf.mxu1  ;;  %v1071_v15 = vmax.f32 %v1015_v59, 0.0  ;;  %v908_v57 = vadd.f32 %v907_v0, %v2268_v22  ;;  %v913_v18 = vpop.f32.mrf.mxu0 }
 0x16c   : > { %v1316_v20 = vadd.f32 %v1176_v60, %v1168_v2  ;;  %v1021_v46 = vadd.f32 %v1020_v13, %v2268_v22  ;;  %v1181_v63 = vmul.f32 %v2281_v17, %v1069_v51  ;;  %v1070_v23 = vmax.f32 %v904_v37, 0.0 }
 0x16d   : > { %v1072_v32 = vmax.f32 %v1017_v30, 0.0  ;;  %v910_v62 = vadd.f32 %v909_v4, %v2268_v22  ;;  %v1026_v19 = vpop.f32.mrf.mxu1  ;;  %v1183_v27 = vmul.f32 %v2281_v17, %v1071_v15  ;;  %v1077_v26 = vmax.f32 %v908_v57, 0.0  ;;  %v915_v10 = vpop.f32.mrf.mxu0 }
 0x16e   : > { %v1079_v47 = vmax.f32 %v1021_v46, 0.0  ;;  %v1023_v11 = vadd.f32 %v1022_v38, %v2268_v22  ;;  %v1278_v43 = vadd.f32 %v1277_v24, %v1181_v63  ;;  %v1182_v53 = vmul.f32 %v2281_v17, %v1070_v23 }
 0x16f   : > { %v1184_v45 = vmul.f32 %v2281_v17, %v1072_v32  ;;  %v1078_v61 = vmax.f32 %v910_v62, 0.0  ;;  %v1028_v36 = vpop.f32.mrf.mxu1  ;;  %v1304_v50 = vadd.f32 %v1303_v58, %v1183_v27  ;;  %v1189_v5 = vmul.f32 %v2295_v35, %v1077_v26  ;;  %v919_v6 = vpop.f32.mrf.mxu0 }
 0x170   : > { %v1191_v2 = vmul.f32 %v2295_v35, %v1079_v47  ;;  %v1080_v3 = vmax.f32 %v1023_v11, 0.0  ;;  %v1291_v29 = vadd.f32 %v1290_v39, %v1182_v53  ;;  %v914_v22 = vadd.f32 %v913_v18, %v2276_v48 }
 0x171   : > { %v1317_v41 = vadd.f32 %v1316_v20, %v1184_v45  ;;  %v1190_v55 = vmul.f32 %v2295_v35, %v1078_v61  ;;  %v1032_v28 = vpop.f32.mrf.mxu1  ;;  %v1279_v9 = vadd.f32 %v1278_v43, %v1189_v5  ;;  %v1027_v34 = vadd.f32 %v1026_v19, %v2276_v48  ;;  %v921_v25 = vpop.f32.mrf.mxu0 }
 0x172   : > { %v1305_v16 = vadd.f32 %v1304_v50, %v1191_v2  ;;  %v1192_v17 = vmul.f32 %v2295_v35, %v1080_v3  ;;  %v1085_v24 = vmax.f32 %v914_v22, 0.0  ;;  %v916_v21 = vadd.f32 %v915_v10, %v2276_v48 }
 0x173   : > { %v1292_v0 = vadd.f32 %v1291_v29, %v1190_v55  ;;  %v1029_v12 = vadd.f32 %v1028_v36, %v2276_v48  ;;  %v1034_v13 = vpop.f32.mrf.mxu1  ;;  %v1087_v60 = vmax.f32 %v1027_v34, 0.0  ;;  %v920_v59 = vadd.f32 %v919_v6, %v2288_v33  ;;  %v925_v39 = vpop.f32.mrf.mxu0 }
 0x174   : > { %v1318_v58 = vadd.f32 %v1317_v41, %v1192_v17  ;;  %v1033_v4 = vadd.f32 %v1032_v28, %v2288_v33  ;;  %v1197_v51 = vmul.f32 %v2312_v44, %v1085_v24  ;;  %v1086_v35 = vmax.f32 %v916_v21, 0.0 }
 0x175   : > { %v1088_v37 = vmax.f32 %v1029_v12, 0.0  ;;  %v922_v30 = vadd.f32 %v921_v25, %v2288_v33  ;;  %v1038_v38 = vpop.f32.mrf.mxu1  ;;  %v1199_v20 = vmul.f32 %v2312_v44, %v1087_v60  ;;  %v1093_v15 = vmax.f32 %v920_v59, 0.0  ;;  %v927_v46 = vpop.f32.mrf.mxu0 }
 0x176   : > { %v1095_v57 = vmax.f32 %v1033_v4, 0.0  ;;  %v1035_v48 = vadd.f32 %v1034_v13, %v2288_v33  ;;  %v1280_v18 = vadd.f32 %v1279_v9, %v1197_v51  ;;  %v1198_v63 = vmul.f32 %v2312_v44, %v1086_v35 }
 0x177   : > { %v1200_v23 = vmul.f32 %v2312_v44, %v1088_v37  ;;  %v1094_v32 = vmax.f32 %v922_v30, 0.0  ;;  %v1040_v62 = vpop.f32.mrf.mxu1  ;;  %v1306_v19 = vadd.f32 %v1305_v16, %v1199_v20  ;;  %v1205_v27 = vmul.f32 %v2328_v42, %v1093_v15  ;;  %v931_v11 = vpop.f32.mrf.mxu0 }
 0x178   : > { %v1207_v26 = vmul.f32 %v2328_v42, %v1095_v57  ;;  %v1096_v47 = vmax.f32 %v1035_v48, 0.0  ;;  %v1293_v10 = vadd.f32 %v1292_v0, %v1198_v63  ;;  %v926_v33 = vadd.f32 %v925_v39, %v2306_v56 }
 0x179   : > { %v1319_v43 = vadd.f32 %v1318_v58, %v1200_v23  ;;  %v1206_v53 = vmul.f32 %v2328_v42, %v1094_v32  ;;  %v1044_v45 = vpop.f32.mrf.mxu1  ;;  %v1281_v61 = vadd.f32 %v1280_v18, %v1205_v27  ;;  %v1039_v50 = vadd.f32 %v1038_v38, %v2306_v56  ;;  %v933_v5 = vpop.f32.mrf.mxu0 }
 0x17a   : > { %v1307_v36 = vadd.f32 %v1306_v19, %v1207_v26  ;;  %v1208_v44 = vmul.f32 %v2328_v42, %v1096_v47  ;;  %v1101_v3 = vmax.f32 %v926_v33, 0.0  ;;  %v928_v6 = vadd.f32 %v927_v46, %v2306_v56 }
 0x17b   : > { %v1294_v2 = vadd.f32 %v1293_v10, %v1206_v53  ;;  %v1041_v29 = vadd.f32 %v1040_v62, %v2306_v56  ;;  %v1046_v41 = vpop.f32.mrf.mxu1  ;;  %v1103_v22 = vmax.f32 %v1039_v50, 0.0  ;;  %v932_v28 = vadd.f32 %v931_v11, %v2322_v52 }
 0x17c   : > { %v1320_v55 = vadd.f32 %v1319_v43, %v1208_v44  ;;  %v1045_v9 = vadd.f32 %v1044_v45, %v2322_v52  ;;  %v1213_v16 = vmul.f32 %v2338_v40, %v1101_v3  ;;  %v1102_v17 = vmax.f32 %v928_v6, 0.0 }
 0x17d   : > { %v1104_v42 = vmax.f32 %v1041_v29, 0.0  ;;  %v934_v34 = vadd.f32 %v933_v5, %v2322_v52  ;;  %v1215_v25 = vmul.f32 %v2338_v40, %v1103_v22  ;;  %v1109_v0 = vmax.f32 %v932_v28, 0.0 }
 0x17e   : > { %v1111_v24 = vmax.f32 %v1045_v9, 0.0  ;;  %v1047_v21 = vadd.f32 %v1046_v41, %v2322_v52  ;;  %v1282_v56 = vadd.f32 %v1281_v61, %v1213_v16  ;;  %v1214_v12 = vmul.f32 %v2338_v40, %v1102_v17 }
 0x17f   : > { %v1216_v13 = vmul.f32 %v2338_v40, %v1104_v42  ;;  %v1110_v58 = vmax.f32 %v934_v34, 0.0  ;;  %v1308_v60 = vadd.f32 %v1307_v36, %v1215_v25  ;;  %v1221_v59 = vmul.f32 %v2348_v54, %v1109_v0 }
 0x180   : > { %v1223_v4 = vmul.f32 %v2348_v54, %v1111_v24  ;;  %v1112_v39 = vmax.f32 %v1047_v21, 0.0  ;;  %v1235_v51 = vadd.f32 %v1234_v8, %v2362_v7  ;;  %v1261_v52 = vadd.f32 %v1260_v14, %v2366_v31 }
 0x181   : > { %v1295_v35 = vadd.f32 %v1294_v2, %v1214_v12  ;;  %v1222_v37 = vmul.f32 %v2348_v54, %v1110_v58  ;;  %v1321_v30 = vadd.f32 %v1320_v55, %v1216_v13  ;;  %v1283_v40 = vadd.f32 %v1282_v56, %v1221_v59 }
 0x182   : > { %v1309_v38 = vadd.f32 %v1308_v60, %v1223_v4  ;;  %v1224_v20 = vmul.f32 %v2348_v54, %v1112_v39  ;;  %v1699_v57 = vmov 1966171168   ;;  %v1344_v46 = vlaneseq }
 0x183   : > { %v1296_v15 = vadd.f32 %v1295_v35, %v1222_v37  ;;  %v1342_v48 = vunpack.c.l.s4 %v1699_v57  ;;  %v1249_v18 = vrot.slane %v2378_v1, 1  ;;  %v1284_v63 = vrot.slane %v1283_v40, 4 }
 0x184   : > { %v1310_v7 = vrot.slane %v1309_v38, 4  ;;  %v1322_v8 = vadd.f32 %v1321_v30, %v1224_v20  ;;  %v1275_v23 = vrot.slane %v2382_v49, 1  ;;  %v1236_v14 = vrot.slane %v1235_v51, 1 }
 0x185   : > { %v1297_v31 = vrot.slane %v1296_v15, 4  ;;  %v1285_v32 = vadd.f32 %v1284_v63, %v1283_v40  ;;  %v1262_v27 = vrot.slane %v1261_v52, 1  ;;  %v1343_v47 = vunpack.c.0.s8 %v1342_v48 }
 0x186   : > { %v1311_v62 = vadd.f32 %v1310_v7, %v1309_v38  ;;  %v1323_v19 = vrot.slane %v1322_v8, 4  ;;  %v1345_v54 = vshrl.u32 %v1344_v46, 7  ;;  %v1250_v11 = vadd.f32 %v1249_v18, %v2378_v1 }
 0x187   : > { %v1298_v26 = vadd.f32 %v1297_v31, %v1296_v15  ;;  %v1286_v10 = vrot.slane %v1285_v32, 2  ;;  %v1276_v33 = vadd.f32 %v1275_v23, %v2382_v49  ;;  %v1237_v61 = vadd.f32 %v1236_v14, %v1235_v51 }
 0x188   : > { %v1312_v43 = vrot.slane %v1311_v62, 2  ;;  %v1324_v53 = vadd.f32 %v1323_v19, %v1322_v8  ;;  %v1263_v5 = vadd.f32 %v1262_v27, %v1261_v52  ;;  %v1346_v3 = vsub.s32 %v1343_v47, %v1345_v54 }
 0x189   : > { %v1299_v45 = vrot.slane %v1298_v26, 2  ;;  %v1287_v36 = vadd.f32 %v1286_v10, %v1285_v32  ;;  %v1337_v6 = vcombine.low %v1237_v61, %v1250_v11 }
 0x18a   : > { %v1313_v44 = vadd.f32 %v1312_v43, %v1311_v62  ;;  %v1325_v50 = vrot.slane %v1324_v53, 2  ;;  %v1338_v22 = vcombine.low %v1263_v5, %v1276_v33 }
 0x18b   : > { %v1300_v2 = vadd.f32 %v1299_v45, %v1298_v26  ;;  %v1288_v29 = vrot.slane %v1287_v36, 1  ;;  %v1347_v42 = vrot.slane %v1337_v6, %v1346_v3 }
 0x18c   : > { %v1314_v41 = vrot.slane %v1313_v44, 1  ;;  %v1326_v55 = vadd.f32 %v1325_v50, %v1324_v53  ;;  %v1354_v34 = vrot.slane %v1338_v22, %v1346_v3 }
 0x18d   : > { %v1301_v1 = vrot.slane %v1300_v2, 1  ;;  %v1289_v9 = vadd.f32 %v1288_v29, %v1287_v36 }
 0x18e   : > { %v1327_v28 = vrot.slane %v1326_v55, 1  ;;  %v1315_v49 = vadd.f32 %v1314_v41, %v1313_v44  ;;  %v1369_v56 = vcombine.low %v1347_v42, %v1354_v34 }
 0x18f   : > { %v1302_v16 = vadd.f32 %v1301_v1, %v1300_v2 }
 0x190   : > { %v1328_v17 = vadd.f32 %v1327_v28, %v1326_v55  ;;  %v1377_v13 = vrot.slane %v1369_v56, %v1346_v3 }
 0x191   : > { %v1339_v25 = vcombine.low %v1289_v9, %v1302_v16 }
 0x192   : > { %v1340_v0 = vcombine.low %v1315_v49, %v1328_v17 }
 0x193   : > { %v1361_v24 = vrot.slane %v1339_v25, %v1346_v3 }
 0x194   : > { %v1368_v21 = vrot.slane %v1340_v0, %v1346_v3 }
 0x196   : > { %v1370_v12 = vcombine.low %v1361_v24, %v1368_v21 }
 0x198   : > { %v1384_v58 = vrot.slane %v1370_v12, %v1346_v3 }
 0x19a   : > { %v1385_v60 = vcombine.low %v1377_v13, %v1384_v58 }
 0x19c   : > { %1387 = vst [vmem:[%s215_s8] sm:$0xff] %v1385_v60 }
 0x19d   : > { %1640 = shalt.err (!%p1637_p9)
}
 0x19e   : > { %s1641_s9 = scalar_lea.hbm %s1401_s28, 128  ;;  %s1645_s14 = scalar_lea.hbm %s2481_s4, 384 }
 0x19f   : > { %p1642_p0 = scmp.ne.s32.totalorder %s1401_s28, %s1641_s9  ;;  %p1646_p1 = scmp.lt.s32.totalorder %s1401_s28, %s2481_s4 }
 0x1a0   : > { %p1647_p3 = scmp.lt.s32.totalorder %s1645_s14, %s1641_s9 }
 0x1a1   : > { %p1643_p2 = pnand %p1642_p0, %p2490_p11 }
 0x1a2   : > { %p1648_p6 = por %p1647_p3, %p1646_p1 }
 0x1a3   : > { %p1644_p13 = pneg %p1643_p2 }
 0x1a5   : > { %p1649_p10 = pnand %p1648_p6, %p1644_p13 }
 0x1a7   : > { %1652 = shalt.err (!%p1649_p10)
}
 0x1a8   : > { %1531 = dma.vmem_to_hbm [thread:$0]  (%p2490_p11), %s1404_s10, 128, %s1401_s28, %s1389_s29  }
 0x1a9 PF: > { %p1542_p12 = scmp.ge.s32.totalorder %s1691_s18, 2  ;;  %s1415_s25 = sand.u32 1, %s1679_s15  }
 0x1aa   : > { %p2491_p4 = scmp.ne.s32.totalorder %s2486_s27, 0  ;;  %s1416_s7 = scalar_lea.sflag [#allocation4], %s1415_s25 }
 0x1ac   : > { %p1538_p5 = pnand %p1542_p12, %p2491_p4 }
 0x1ae   : > { %p1539_p7 = pneg %p1538_p5 }
 0x1b0   : > { %1674 = dma.done.wait (%p1539_p7), %s1416_s7, 128  }
 0x1b1   : > { %1676 = vsyncadd (%p1539_p7), %s1416_s7, 4294967168  ;;  %p17_p8 = scmp.ge.s32.totalorder %s1751_s21, 5   ;;  %s2492_s15 = smov %s1683_s16 }
 0x1b2   : > { %s2493_s16 = smov %s1687_s17  ;;  %s2494_s17 = smov %s1763_s24 }
 0x1b3   : > { %s2495_s18 = smov %s1751_s21  ;;  %19 = sbr.rel (!%p17_p8) target bundleno = 5 (0x5), region = 81 }
 0x1b8   :  { %1421 = vsyncpa [#allocation3], 1 }
 0x1b9   :  { %1423 = vsyncpa [#allocation3 + $0x1], 1 }
 0x1ba   :  { %1424 = vsyncpa [#allocation4], 1 }
 0x1bb   :  { %1426 = vsyncpa [#allocation4 + $0x1], 1 }

</bundles_post_ra>
